<compile_context>
chip_gen: v7x
topology: tpu7x:2x2x1
jax: 0.10.0
libtpu: 0.0.40
codegen_flags: <defaults>
</compile_context>

<pallas_src>
import jax
import jax.numpy as jnp
from jax import lax
from jax.experimental import pallas as pl
from jax.experimental.pallas import tpu as pltpu

BN_EPS = 1e-5
C_OUT = 64
# Packed rows per tile (1 packed row = 2 output pixels x 128 lanes).
# 8192 rows -> ~0.3 MiB bf16 patches + 2 MiB bf16 out per buffer,
# x2 double-buffered ~ 4.6 MiB: fits every generation's scoped-VMEM budget
# and keeps the ~0.35 us per-grid-step overhead under ~10% of step time.
TILE_ROWS = 8192
VMEM_LIMIT_BYTES = 32 * 1024 * 1024   # explicit budget (>= v5e 16 MiB default)
SUBLANE = 16                          # bf16 packed-sublane alignment


def _round_up(x, m):
    return ((x + m - 1) // m) * m


def _cdiv(a, b):
    return -(-a // b)


# ---------------------------------------------------------------------------
# Pallas kernels: tiled matmul on packed patches with fused shift (+ ReLU).
# f32 accumulate, bf16 store.
# ---------------------------------------------------------------------------
def _matmul_shift_relu_kernel(p_ref, w_ref, s_ref, o_ref):
    acc = jnp.dot(p_ref[...], w_ref[...], preferred_element_type=jnp.float32)
    o_ref[...] = jnp.maximum(acc + s_ref[...], 0.0).astype(o_ref.dtype)


def _matmul_shift_kernel(p_ref, w_ref, s_ref, o_ref):
    acc = jnp.dot(p_ref[...], w_ref[...], preferred_element_type=jnp.float32)
    o_ref[...] = (acc + s_ref[...]).astype(o_ref.dtype)


def _packed_dense(patches, wmat, shift, *, relu):
    """patches (P,K) bf16, wmat (K,64) f32, shift (64,) f32 -> (P,64) bf16.

    Packs two consecutive output pixels per 128-lane row via a block-diagonal
    weight so output stores are lane-dense.  Streams bf16, accumulates f32.
    """
    P, K = patches.shape
    P2 = _round_up(_cdiv(P, 2), SUBLANE)     # packed rows, bf16-sublane aligned
    p_pad = 2 * P2

    # >= 2 grid steps whenever possible so v7x's 2 TCs both get work; large P
    # still uses TILE_ROWS-sized blocks.  Ragged last block handled by Pallas.
    half = _round_up(_cdiv(P2, 2), SUBLANE)
    tile = min(TILE_ROWS, half)
    grid = _cdiv(P2, tile)

    patches = patches.astype(jnp.bfloat16)   # no-op if caller already cast
    if p_pad > P:
        patches = jnp.pad(patches, ((0, p_pad - P), (0, 0)))
    packed = patches.reshape(P2, 2 * K)      # row-major view

    # Block-diagonal weight -> 128-wide lane-dense output rows.
    wb = jnp.zeros((2 * K, 2 * C_OUT), jnp.float32)
    wb = wb.at[:K, :C_OUT].set(wmat).at[K:, C_OUT:].set(wmat)
    wb = wb.astype(jnp.bfloat16)
    sb = jnp.concatenate([shift, shift]).reshape(1, 2 * C_OUT).astype(jnp.float32)

    kernel = _matmul_shift_relu_kernel if relu else _matmul_shift_kernel
    out = pl.pallas_call(
        kernel,
        out_shape=jax.ShapeDtypeStruct((P2, 2 * C_OUT), jnp.bfloat16),
        grid_spec=pltpu.PrefetchScalarGridSpec(
            num_scalar_prefetch=0,
            grid=(grid,),
            in_specs=[
                pl.BlockSpec((tile, 2 * K), lambda i: (i, 0)),       # patches
                pl.BlockSpec((2 * K, 2 * C_OUT), lambda i: (0, 0)),  # weight
                pl.BlockSpec((1, 2 * C_OUT), lambda i: (0, 0)),      # shift
            ],
            out_specs=pl.BlockSpec((tile, 2 * C_OUT), lambda i: (i, 0)),
        ),
        compiler_params=pltpu.CompilerParams(
            dimension_semantics=("parallel",),       # v7x: shard over 2 TCs
            vmem_limit_bytes=VMEM_LIMIT_BYTES),
    )(packed, wb, sb)
    # (P2,128) -> (2*P2,64) is a free row-major view.  Keep the [:P] slice:
    # padded tail rows hold max(shift, 0) garbage.
    return out.reshape(p_pad, C_OUT)[:P]


# ---------------------------------------------------------------------------
# conv3d branch: Conv3d(1,64,k=(1,3,3),s=(1,3,3),p=(0,0,2)) + BN3d + ReLU
# (Dropout is identity in eval mode.)  Output channels-last (N,D,Ho,Wo,64) bf16.
# ---------------------------------------------------------------------------
@jax.jit
def conv3d_bn_relu(x, w, b, gamma, beta, run_mean, run_var):
    N, C, D, H, W = x.shape
    assert C == 1
    kH = kW = 3
    sH = sW = 3
    padW = 2
    Ho = (H - kH) // sH + 1
    Wo = (W + 2 * padW - kW) // sW + 1

    # bf16 cast fused into the pad/im2col pass -> patches materialize once (bf16).
    xp = jnp.pad(x.astype(jnp.bfloat16),
                 ((0, 0), (0, 0), (0, 0), (0, 0), (padW, padW)))
    # stride == kernel (non-overlapping) -> patches via slice + reshape
    xs = xp[:, 0, :, :Ho * sH, :Wo * sW]
    patches = (xs.reshape(N, D, Ho, kH, Wo, kW)
                 .transpose(0, 1, 2, 4, 3, 5)
                 .reshape(N * D * Ho * Wo, kH * kW))

    # Fold bias + BatchNorm (eval) into weight + shift (f32, host-side, tiny).
    wmat = w.reshape(C_OUT, kH * kW).T                       # (9, 64)
    scale = gamma * lax.rsqrt(run_var + BN_EPS)              # (64,)
    w_fold = wmat * scale[None, :]
    shift = (b - run_mean) * scale + beta

    out = _packed_dense(patches, w_fold, shift, relu=True)   # (P, 64) bf16
    return out.reshape(N, D, Ho, Wo, C_OUT)                  # channels-last


# ---------------------------------------------------------------------------
# conv2d branch: Conv2d(1, 64, k=(1,3), s=(1,3), p=0).  Output (N,H,Wo,64) bf16.
# ---------------------------------------------------------------------------
@jax.jit
def conv2d_branch(x, w, b):
    N, C, H, W = x.shape
    assert C == 1
    kW = 3
    sW = 3
    Wo = (W - kW) // sW + 1

    xs = x[:, 0, :, :Wo * sW].astype(jnp.bfloat16)
    patches = xs.reshape(N * H * Wo, kW)                     # pure view
    wmat = w.reshape(C_OUT, kW).T                            # (3, 64)

    out = _packed_dense(patches, wmat, b, relu=False)        # (P, 64) bf16
    return out.reshape(N, H, Wo, C_OUT)                      # channels-last


# ---------------------------------------------------------------------------
# references (pure JAX, f32) for sanity checking
# ---------------------------------------------------------------------------
def _ref_conv3d(x, w, b, gamma, beta, mean, var):
    y = lax.conv_general_dilated(
        x, w, window_strides=(1, 3, 3),
        padding=[(0, 0), (0, 0), (2, 2)],
        dimension_numbers=('NCDHW', 'OIDHW', 'NCDHW'))
    rs = lambda v: v.reshape(1, C_OUT, 1, 1, 1)
    y = y + rs(b)
    y = (y - rs(mean)) * lax.rsqrt(rs(var) + BN_EPS) * rs(gamma) + rs(beta)
    return jnp.maximum(y, 0.0)


def _ref_conv2d(x, w, b):
    y = lax.conv_general_dilated(
        x, w, window_strides=(1, 3), padding=[(0, 0), (0, 0)],
        dimension_numbers=('NCHW', 'OIHW', 'NCHW'))
    return y + b.reshape(1, C_OUT, 1, 1)


if __name__ == "__main__":
    key = jax.random.PRNGKey(0)
    ks = jax.random.split(key, 6)

    # deterministic parameter init (shapes from my_cnn.__init__)
    w3 = jax.random.normal(ks[0], (C_OUT, 1, 1, 3, 3), jnp.float32) * 0.1
    b3 = jax.random.normal(ks[1], (C_OUT,), jnp.float32) * 0.1
    # BatchNorm3d(64) eval-mode defaults: weight=1, bias=0, mean=0, var=1
    gamma = jnp.ones((C_OUT,), jnp.float32)
    beta = jnp.zeros((C_OUT,), jnp.float32)
    run_mean = jnp.zeros((C_OUT,), jnp.float32)
    run_var = jnp.ones((C_OUT,), jnp.float32)

    w2 = jax.random.normal(ks[2], (C_OUT, 1, 1, 3), jnp.float32) * 0.1
    b2 = jax.random.normal(ks[3], (C_OUT,), jnp.float32) * 0.1

    # small inputs consistent with the module
    x3d = jax.random.normal(ks[4], (2, 1, 4, 9, 16), jnp.float32)   # NCDHW
    x2d = jax.random.normal(ks[5], (2, 1, 8, 15), jnp.float32)      # NCHW

    y3 = conv3d_bn_relu(x3d, w3, b3, gamma, beta, run_mean, run_var)
    y2 = conv2d_branch(x2d, w2, b2)
    jax.block_until_ready((y3, y2))

    # references, moved to channels-last to match the kernel output layout
    ref3 = jnp.moveaxis(_ref_conv3d(x3d, w3, b3, gamma, beta,
                                    run_mean, run_var), 1, -1)
    ref2 = jnp.moveaxis(_ref_conv2d(x2d, w2, b2), 1, -1)

    assert y3.shape == (2, 4, 3, 6, C_OUT), y3.shape
    assert y2.shape == (2, 8, 5, C_OUT), y2.shape
    assert y3.dtype == jnp.bfloat16 and y2.dtype == jnp.bfloat16
    # bf16-streamed inputs + bf16 output -> looser tolerance than pure f32
    assert jnp.allclose(y3.astype(jnp.float32), ref3, atol=3e-2, rtol=3e-2)
    assert jnp.allclose(y2.astype(jnp.float32), ref2, atol=3e-2, rtol=3e-2)

    print("KERNEL_OK")
</pallas_src>

<mosaic_0001>
module attributes {stable_mosaic.version = 11 : i64} {
  func.func @_matmul_shift_relu_kernel(%arg0: i32, %arg1: memref<48x18xbf16, #tpu.memory_space<vmem>>, %arg2: memref<18x128xbf16, #tpu.memory_space<vmem>>, %arg3: memref<1x128xf32, #tpu.memory_space<vmem>>, %arg4: memref<48x128xbf16, #tpu.memory_space<vmem>>) attributes {dimension_semantics = [#tpu.dimension_semantics<parallel>], iteration_bounds = array<i64: 2>, scalar_prefetch = 0 : i64, scratch_operands = 0 : i64, tpu.core_type = #tpu.core_type<tc>, window_params = [{transform_indices = @transform_0, window_bounds = array<i64: 48, 18>}, {pipeline_mode = #tpu.pipeline_mode<synchronous>, transform_indices = @transform_1, window_bounds = array<i64: 18, 128>}, {pipeline_mode = #tpu.pipeline_mode<synchronous>, transform_indices = @transform_2, window_bounds = array<i64: 1, 128>}, {transform_indices = @transform_3, window_bounds = array<i64: 48, 128>}]} {
    %c0 = arith.constant 0 : index
    %c0_0 = arith.constant 0 : index
    %0 = vector.load %arg1[%c0, %c0_0] : memref<48x18xbf16, #tpu.memory_space<vmem>>, vector<48x18xbf16>
    %c0_1 = arith.constant 0 : index
    %c0_2 = arith.constant 0 : index
    %1 = vector.load %arg2[%c0_1, %c0_2] : memref<18x128xbf16, #tpu.memory_space<vmem>>, vector<18x128xbf16>
    %cst = arith.constant dense<0.000000e+00> : vector<48x128xf32>
    %2 = tpu.matmul %0, %1, %cst {dimension_numbers = #tpu.dot_dimension_numbers<[1], [0], [0], [1], [0, 0, 1, 1], [], []>} : vector<48x18xbf16>, vector<18x128xbf16>, vector<48x128xf32> -> vector<48x128xf32>
    %c0_3 = arith.constant 0 : index
    %c0_4 = arith.constant 0 : index
    %3 = vector.load %arg3[%c0_3, %c0_4] : memref<1x128xf32, #tpu.memory_space<vmem>>, vector<1x128xf32>
    %4 = vector.broadcast %3 : vector<1x128xf32> to vector<48x128xf32>
    %5 = arith.addf %2, %4 : vector<48x128xf32>
    %cst_5 = arith.constant 0.000000e+00 : f32
    %6 = vector.broadcast %cst_5 : f32 to vector<48x128xf32>
    %7 = arith.maximumf %5, %6 : vector<48x128xf32>
    %8 = arith.truncf %7 : vector<48x128xf32> to vector<48x128xbf16>
    %c0_6 = arith.constant 0 : index
    %c0_7 = arith.constant 0 : index
    %9 = vector.load %arg4[%c0_6, %c0_7] : memref<48x128xbf16, #tpu.memory_space<vmem>>, vector<48x128xbf16>
    tpu.vector_store %arg4[%c0_6, %c0_7], %8 {strides = array<i32>} : memref<48x128xbf16, #tpu.memory_space<vmem>>, vector<48x128xbf16>,
    return
  }
  func.func @transform_0(%arg0: i32) -> (i32, i32) {
    %c0_i32 = arith.constant 0 : i32
    %c0_i32_0 = arith.constant 0 : i32
    return %arg0, %c0_i32 : i32, i32
  }
  func.func @transform_1(%arg0: i32) -> (i32, i32) {
    %c0_i32 = arith.constant 0 : i32
    %c0_i32_0 = arith.constant 0 : i32
    %c0_i32_1 = arith.constant 0 : i32
    return %c0_i32, %c0_i32_0 : i32, i32
  }
  func.func @transform_2(%arg0: i32) -> (i32, i32) {
    %c0_i32 = arith.constant 0 : i32
    %c0_i32_0 = arith.constant 0 : i32
    %c0_i32_1 = arith.constant 0 : i32
    return %c0_i32, %c0_i32_0 : i32, i32
  }
  func.func @transform_3(%arg0: i32) -> (i32, i32) {
    %c0_i32 = arith.constant 0 : i32
    %c0_i32_0 = arith.constant 0 : i32
    return %arg0, %c0_i32 : i32, i32
  }
}

</mosaic_0001>

<bundles_post_ra>
// kernel: squeeze.1
= control target key start
LH: loop header
LB: loop body
LE: loop exit
PB: predicated region body
PF: predicated region fallthrough
CT: control target
= control target key end

     0   :  { %vm290_vm0 = vcmask 23552   ;;  %s1776_s16 = smov 122   ;;  %s1777_s17 = smov 119   ;;  %s2021_s0 = inlined_call_operand.vmem [shape: bf16[2,1,4,9,18], index: 0, kind: input, shape index: {}]   ;;  %s2022_s1 = inlined_call_operand.vmem [shape: bf16[2,4,3,3,6,3], index: 1, kind: output, shape index: {}]  }
   0x1   :  { %v1381_v0 = vld [vmem:[%s2021_s0 + $0x6] sm:$0xff]   ;;  %v1382_v1 = vld [vmem:[%s2021_s0 + $0x2] ss:$28 sps:$4 sm:$0xff]   ;;  %v1373_v6 = vld [vmem:[%s2021_s0 + $0x16] sm:$0xff]   ;;  %s1778_s18 = smov 116   ;;  %s1779_s19 = smov 113  }
   0x2   :  { %v285_v2 = vld [vmem:[%s2021_s0] ss:$34 sps:$2 sm:$0xf]   ;;  %v241_v3 = vunpack.c.l.bf16 %v1381_v0  ;;  %v257_v4 = vunpack.c.l.bf16 %v1382_v1  ;;  %v1374_v7 = vld [vmem:[%s2021_s0 + $0xe] sm:$0xff]   ;;  %v113_v8 = vunpack.c.l.bf16 %v1373_v6  ;;  %v193_v11 = vunpack.c.h.bf16 %v1381_v0  ;;  %s1775_s0 = smov 125  }
   0x3   :  { %v286_v5 = vunpack.c.l.bf16 %v285_v2  ;;  %v129_v9 = vunpack.c.h.bf16 %v1374_v7  ;;  %v161_v10 = vunpack.c.l.bf16 %v1374_v7  ;;  %v49_v12 = vunpack.c.h.bf16 %v1382_v1 }
   0x4   :  { %244 = vst [vmem:[#allocation1 + $0x18] ss:$8 sps:$4 sm:$0xff] %v241_v3   ;;  %260 = vst [vmem:[#allocation1 + $0x8] ss:$8 sps:$4 sm:$0xff] %v257_v4   ;;  %v65_v13 = vunpack.c.h.bf16 %v1373_v6 }
   0x5   :  { %288 = vst [vmem:[#allocation1] ss:$136 sps:$4 sm:$0xff] %v286_v5   ;;  %116 = vst [vmem:[#allocation1 + $0x58] ss:$8 sps:$4 sm:$0xff] %v113_v8  }
   0x6   :  { %132 = vst [vmem:[#allocation1 + $0x48] ss:$8 sps:$4 sm:$0xff] %v129_v9   ;;  %164 = vst [vmem:[#allocation1 + $0x38] ss:$8 sps:$4 sm:$0xff] %v161_v10  }
   0x7   :  { %196 = vst [vmem:[#allocation1 + $0x28] ss:$8 sps:$4 sm:$0xff] %v193_v11   ;;  %52 = vst [vmem:[#allocation1 + $0x78] ss:$8 sps:$4 sm:$0xff] %v49_v12  }
   0x8   :  { %68 = vst [vmem:[#allocation1 + $0x68] ss:$8 sps:$4 sm:$0xff] %v65_v13  }
   0xb   :  { %v293_v15 = vld [vmem:[#allocation1 + $0x8] sm:$0xf]   ;;  %v298_v16 = vld [vmem:[#allocation1 + $0x10] sm:$0xf]   ;;  %v303_v20 = vld [vmem:[#allocation1 + $0x18] sm:$0xf]  }
   0xc   :  { %v289_v14 = vld [vmem:[#allocation1] sm:$0xf]   ;;  %296 = vst.msk [vmem:[#allocation0 + $0x20] ss:$8 sm:$0xf] %vm290_vm0, %v293_v15  }
   0xd   :  { %291 = vst.msk [vmem:[#allocation0] ss:$8 sm:$0xf] %vm290_vm0, %v289_v14   ;;  %301 = vst.msk [vmem:[#allocation0 + $0x40] ss:$8 sm:$0xf] %vm290_vm0, %v298_v16  }
   0xe   :  { %v377_v17 = vld.sshfl [vmem:[#allocation1] sm:$0xff pattern:$0xba983210]   ;;  %v386_v18 = vld.sshfl [vmem:[#allocation1 + $0x10] sm:$0xff pattern:$0xba983210]  }
   0xf   :  { %v1675_v19 = vpack.i.bf16 %v386_v18, %v377_v17  ;;  %v328_v21 = vld [vmem:[#allocation1 + $0x40] sm:$0xf]   ;;  %v333_v22 = vld [vmem:[#allocation1 + $0x48] sm:$0xf]   ;;  %v338_v23 = vld [vmem:[#allocation1 + $0x50] sm:$0xf]  }
  0x10   :  { %306 = vst.msk [vmem:[#allocation0 + $0x60] ss:$8 sm:$0xf] %vm290_vm0, %v303_v20   ;;  %331 = vst.msk [vmem:[#allocation0 + $0x100] ss:$8 sm:$0xf] %vm290_vm0, %v328_v21  }
  0x11   :  { %336 = vst.msk [vmem:[#allocation0 + $0x120] ss:$8 sm:$0xf] %vm290_vm0, %v333_v22   ;;  %v413_v24 = vld.sshfl [vmem:[#allocation1 + $0x40] sm:$0xff pattern:$0xba983210]   ;;  %1676 = vrot.lane.b32.xlu0 %v1675_v19, %s1775_s0 }
  0x12   :  { %341 = vst.msk [vmem:[#allocation0 + $0x140] ss:$8 sm:$0xf] %vm290_vm0, %v338_v23   ;;  %v422_v25 = vld.sshfl [vmem:[#allocation1 + $0x50] sm:$0xff pattern:$0xba983210]  }
  0x13   :  { %v343_v26 = vld [vmem:[#allocation1 + $0x58] sm:$0xf]   ;;  %v1685_v27 = vpack.i.bf16 %v422_v25, %v413_v24  ;;  %v395_v28 = vld.sshfl [vmem:[#allocation1 + $0x20] sm:$0xff pattern:$0xba983210]  }
  0x14   :  { %346 = vst.msk [vmem:[#allocation0 + $0x160] ss:$8 sm:$0xf] %vm290_vm0, %v343_v26   ;;  %v404_v29 = vld.sshfl [vmem:[#allocation1 + $0x30] sm:$0xff pattern:$0xba983210]  }
  0x15   :  { %v1680_v30 = vpack.i.bf16 %v404_v29, %v395_v28  ;;  %v431_v31 = vld.sshfl [vmem:[#allocation1 + $0x60] sm:$0xff pattern:$0xba983210]   ;;  %v440_v32 = vld.sshfl [vmem:[#allocation1 + $0x70] sm:$0xff pattern:$0xba983210]   ;;  %1686 = vrot.lane.b32.xlu1 %v1685_v27, %s1775_s0 }
  0x16   :  { %v1690_v33 = vpack.i.bf16 %v440_v32, %v431_v31  ;;  %v449_v34 = vld.sshfl [vmem:[#allocation1 + $0x80] sm:$0xff pattern:$0xba983210]   ;;  %v318_v37 = vld [vmem:[#allocation1 + $0x30] sm:$0xf]  }
  0x17   :  { %1681 = vrot.lane.b32.xlu0 %v1680_v30, %s1775_s0  ;;  %v308_v35 = vld [vmem:[#allocation1 + $0x20] sm:$0xf]   ;;  %v313_v36 = vld [vmem:[#allocation1 + $0x28] sm:$0xf]   ;;  %v323_v38 = vld [vmem:[#allocation1 + $0x38] sm:$0xf]  }
  0x18   :  { %311 = vst.msk [vmem:[#allocation0 + $0x80] ss:$8 sm:$0xf] %vm290_vm0, %v308_v35   ;;  %316 = vst.msk [vmem:[#allocation0 + $0xa0] ss:$8 sm:$0xf] %vm290_vm0, %v313_v36  }
  0x19   :  { %1691 = vrot.lane.b32.xlu1 %v1690_v33, %s1775_s0  ;;  %321 = vst.msk [vmem:[#allocation0 + $0xc0] ss:$8 sm:$0xf] %vm290_vm0, %v318_v37   ;;  %326 = vst.msk [vmem:[#allocation0 + $0xe0] ss:$8 sm:$0xf] %vm290_vm0, %v323_v38  }
  0x1a   :  { %v348_v39 = vld [vmem:[#allocation1 + $0x60] sm:$0xf]   ;;  %v353_v40 = vld [vmem:[#allocation1 + $0x68] sm:$0xf]   ;;  %v358_v41 = vld [vmem:[#allocation1 + $0x70] sm:$0xf]  }
  0x1b   :  { %450 = vrot.lane.b32.xlu0 %v449_v34, %s1775_s0  ;;  %351 = vst.msk [vmem:[#allocation0 + $0x180] ss:$8 sm:$0xf] %vm290_vm0, %v348_v39   ;;  %356 = vst.msk [vmem:[#allocation0 + $0x1a0] ss:$8 sm:$0xf] %vm290_vm0, %v353_v40  }
  0x1c   :  { %361 = vst.msk [vmem:[#allocation0 + $0x1c0] ss:$8 sm:$0xf] %vm290_vm0, %v358_v41   ;;  %v363_v42 = vld [vmem:[#allocation1 + $0x78] sm:$0xf]  }
  0x1d   :  { %1696 = vrot.lane.b32.xlu1 %v1675_v19, %s1776_s16  ;;  %366 = vst.msk [vmem:[#allocation0 + $0x1e0] ss:$8 sm:$0xf] %vm290_vm0, %v363_v42   ;;  %v368_v43 = vld [vmem:[#allocation1 + $0x80] sm:$0xf]  }
  0x1e   :  { %v373_v44 = vld [vmem:[#allocation1 + $0x88] sm:$0xf]   ;;  %371 = vst.msk [vmem:[#allocation0 + $0x200] ss:$8 sm:$0xf] %vm290_vm0, %v368_v43  }
  0x1f   :  { %1701 = vrot.lane.b32.xlu0 %v1680_v30, %s1776_s16  ;;  %376 = vst.msk [vmem:[#allocation0 + $0x220] ss:$8 sm:$0xf] %vm290_vm0, %v373_v44  }
  0x21   :  { %1706 = vrot.lane.b32.xlu1 %v1685_v27, %s1776_s16 }
  0x23   :  { %1711 = vrot.lane.b32.xlu0 %v1690_v33, %s1776_s16 }
  0x25   :  { %530 = vrot.lane.b32.xlu1 %v449_v34, %s1776_s16 }
  0x27   :  { %1716 = vrot.lane.b32.xlu0 %v1675_v19, %s1777_s17 }
  0x29   :  { %1721 = vrot.lane.b32.xlu1 %v1680_v30, %s1777_s17 }
  0x2b   :  { %1726 = vrot.lane.b32.xlu0 %v1685_v27, %s1777_s17 }
  0x2d   :  { %1731 = vrot.lane.b32.xlu1 %v1690_v33, %s1777_s17 }
  0x2f   :  { %610 = vrot.lane.b32.xlu0 %v449_v34, %s1777_s17 }
  0x31   :  { %1736 = vrot.lane.b32.xlu1 %v1675_v19, %s1778_s18 }
  0x33   :  { %1741 = vrot.lane.b32.xlu0 %v1680_v30, %s1778_s18 }
  0x35   :  { %1746 = vrot.lane.b32.xlu1 %v1685_v27, %s1778_s18 }
  0x37   :  { %1751 = vrot.lane.b32.xlu0 %v1690_v33, %s1778_s18 }
  0x39   :  { %690 = vrot.lane.b32.xlu1 %v449_v34, %s1778_s18 }
  0x3b   :  { %1756 = vrot.lane.b32.xlu0 %v1675_v19, %s1779_s19 }
  0x3d   :  { %1761 = vrot.lane.b32.xlu1 %v1680_v30, %s1779_s19 }
  0x3f   :  { %1766 = vrot.lane.b32.xlu0 %v1685_v27, %s1779_s19 }
  0x41   :  { %1771 = vrot.lane.b32.xlu1 %v1690_v33, %s1779_s19 }
  0x43   :  { %770 = vrot.lane.b32.xlu0 %v449_v34, %s1779_s19 }
  0x83   :  { %v1677_v45 = vpop.permute.xlu0 %1676 }
  0x84   :  { %v1679_v46 = vunpack.i.h.bf16 %v1677_v45  ;;  %v1678_v47 = vunpack.i.l.bf16 %v1677_v45 }
  0x86   :  { %391 = vst.msk [vmem:[#allocation0 + $0x41] ss:$8 sm:$0xf] %vm290_vm0, %v1679_v46   ;;  %393 = vst.msk [vmem:[#allocation0 + $0x41] ss:$8 sm:$0xf0] %vm290_vm0, %v1679_v46  }
  0x87   :  { %382 = vst.msk [vmem:[#allocation0 + $0x1] ss:$8 sm:$0xf] %vm290_vm0, %v1678_v47   ;;  %384 = vst.msk [vmem:[#allocation0 + $0x1] ss:$8 sm:$0xf0] %vm290_vm0, %v1678_v47   ;;  %v1687_v48 = vpop.permute.xlu1 %1686 }
  0x88   :  { %v1689_v49 = vunpack.i.h.bf16 %v1687_v48  ;;  %v1688_v50 = vunpack.i.l.bf16 %v1687_v48 }
  0x89   :  { %v1682_v51 = vpop.permute.xlu0 %1681 }
  0x8a   :  { %v1684_v52 = vunpack.i.h.bf16 %v1682_v51  ;;  %v1683_v53 = vunpack.i.l.bf16 %v1682_v51  ;;  %427 = vst.msk [vmem:[#allocation0 + $0x141] ss:$8 sm:$0xf] %vm290_vm0, %v1689_v49   ;;  %429 = vst.msk [vmem:[#allocation0 + $0x141] ss:$8 sm:$0xf0] %vm290_vm0, %v1689_v49  }
  0x8b   :  { %418 = vst.msk [vmem:[#allocation0 + $0x101] ss:$8 sm:$0xf] %vm290_vm0, %v1688_v50   ;;  %420 = vst.msk [vmem:[#allocation0 + $0x101] ss:$8 sm:$0xf0] %vm290_vm0, %v1688_v50   ;;  %v1692_v54 = vpop.permute.xlu1 %1691 }
  0x8c   :  { %409 = vst.msk [vmem:[#allocation0 + $0xc1] ss:$8 sm:$0xf] %vm290_vm0, %v1684_v52   ;;  %411 = vst.msk [vmem:[#allocation0 + $0xc1] ss:$8 sm:$0xf0] %vm290_vm0, %v1684_v52   ;;  %v1694_v55 = vunpack.i.h.bf16 %v1692_v54  ;;  %v1693_v56 = vunpack.i.l.bf16 %v1692_v54 }
  0x8d   :  { %400 = vst.msk [vmem:[#allocation0 + $0x81] ss:$8 sm:$0xf] %vm290_vm0, %v1683_v53   ;;  %402 = vst.msk [vmem:[#allocation0 + $0x81] ss:$8 sm:$0xf0] %vm290_vm0, %v1683_v53   ;;  %v451_v57 = vpop.permute.xlu0 %450  }
  0x8e   :  { %454 = vst.msk [vmem:[#allocation0 + $0x201] ss:$8 sm:$0xf] %vm290_vm0, %v451_v57   ;;  %456 = vst.msk [vmem:[#allocation0 + $0x201] ss:$8 sm:$0xf0] %vm290_vm0, %v451_v57  }
  0x8f   :  { %445 = vst.msk [vmem:[#allocation0 + $0x1c1] ss:$8 sm:$0xf] %vm290_vm0, %v1694_v55   ;;  %447 = vst.msk [vmem:[#allocation0 + $0x1c1] ss:$8 sm:$0xf0] %vm290_vm0, %v1694_v55   ;;  %v1697_v58 = vpop.permute.xlu1 %1696 }
  0x90   :  { %436 = vst.msk [vmem:[#allocation0 + $0x181] ss:$8 sm:$0xf] %vm290_vm0, %v1693_v56   ;;  %438 = vst.msk [vmem:[#allocation0 + $0x181] ss:$8 sm:$0xf0] %vm290_vm0, %v1693_v56   ;;  %v1699_v59 = vunpack.i.h.bf16 %v1697_v58  ;;  %v1698_v60 = vunpack.i.l.bf16 %v1697_v58 }
  0x91   :  { %v1702_v61 = vpop.permute.xlu0 %1701 }
  0x92   :  { %v1704_v62 = vunpack.i.h.bf16 %v1702_v61  ;;  %v1703_v63 = vunpack.i.l.bf16 %v1702_v61  ;;  %471 = vst.msk [vmem:[#allocation0 + $0x42] ss:$8 sm:$0xf] %vm290_vm0, %v1699_v59   ;;  %473 = vst.msk [vmem:[#allocation0 + $0x42] ss:$8 sm:$0xf0] %vm290_vm0, %v1699_v59  }
  0x93   :  { %462 = vst.msk [vmem:[#allocation0 + $0x2] ss:$8 sm:$0xf] %vm290_vm0, %v1698_v60   ;;  %464 = vst.msk [vmem:[#allocation0 + $0x2] ss:$8 sm:$0xf0] %vm290_vm0, %v1698_v60   ;;  %v1707_v0 = vpop.permute.xlu1 %1706 }
  0x94   :  { %489 = vst.msk [vmem:[#allocation0 + $0xc2] ss:$8 sm:$0xf] %vm290_vm0, %v1704_v62   ;;  %491 = vst.msk [vmem:[#allocation0 + $0xc2] ss:$8 sm:$0xf0] %vm290_vm0, %v1704_v62   ;;  %v1709_v1 = vunpack.i.h.bf16 %v1707_v0  ;;  %v1708_v2 = vunpack.i.l.bf16 %v1707_v0 }
  0x95   :  { %480 = vst.msk [vmem:[#allocation0 + $0x82] ss:$8 sm:$0xf] %vm290_vm0, %v1703_v63   ;;  %482 = vst.msk [vmem:[#allocation0 + $0x82] ss:$8 sm:$0xf0] %vm290_vm0, %v1703_v63   ;;  %v1712_v3 = vpop.permute.xlu0 %1711 }
  0x96   :  { %v1714_v4 = vunpack.i.h.bf16 %v1712_v3  ;;  %v1713_v5 = vunpack.i.l.bf16 %v1712_v3  ;;  %507 = vst.msk [vmem:[#allocation0 + $0x142] ss:$8 sm:$0xf] %vm290_vm0, %v1709_v1   ;;  %509 = vst.msk [vmem:[#allocation0 + $0x142] ss:$8 sm:$0xf0] %vm290_vm0, %v1709_v1  }
  0x97   :  { %498 = vst.msk [vmem:[#allocation0 + $0x102] ss:$8 sm:$0xf] %vm290_vm0, %v1708_v2   ;;  %500 = vst.msk [vmem:[#allocation0 + $0x102] ss:$8 sm:$0xf0] %vm290_vm0, %v1708_v2   ;;  %v531_v6 = vpop.permute.xlu1 %530  }
  0x98   :  { %525 = vst.msk [vmem:[#allocation0 + $0x1c2] ss:$8 sm:$0xf] %vm290_vm0, %v1714_v4   ;;  %527 = vst.msk [vmem:[#allocation0 + $0x1c2] ss:$8 sm:$0xf0] %vm290_vm0, %v1714_v4  }
  0x99   :  { %516 = vst.msk [vmem:[#allocation0 + $0x182] ss:$8 sm:$0xf] %vm290_vm0, %v1713_v5   ;;  %518 = vst.msk [vmem:[#allocation0 + $0x182] ss:$8 sm:$0xf0] %vm290_vm0, %v1713_v5   ;;  %v1717_v7 = vpop.permute.xlu0 %1716 }
  0x9a   :  { %534 = vst.msk [vmem:[#allocation0 + $0x202] ss:$8 sm:$0xf] %vm290_vm0, %v531_v6   ;;  %536 = vst.msk [vmem:[#allocation0 + $0x202] ss:$8 sm:$0xf0] %vm290_vm0, %v531_v6   ;;  %v1719_v8 = vunpack.i.h.bf16 %v1717_v7  ;;  %v1718_v9 = vunpack.i.l.bf16 %v1717_v7 }
  0x9b   :  { %v1722_v10 = vpop.permute.xlu1 %1721 }
  0x9c   :  { %551 = vst.msk [vmem:[#allocation0 + $0x43] ss:$8 sm:$0xf] %vm290_vm0, %v1719_v8   ;;  %553 = vst.msk [vmem:[#allocation0 + $0x43] ss:$8 sm:$0xf0] %vm290_vm0, %v1719_v8   ;;  %v1724_v11 = vunpack.i.h.bf16 %v1722_v10  ;;  %v1723_v12 = vunpack.i.l.bf16 %v1722_v10 }
  0x9d   :  { %542 = vst.msk [vmem:[#allocation0 + $0x3] ss:$8 sm:$0xf] %vm290_vm0, %v1718_v9   ;;  %544 = vst.msk [vmem:[#allocation0 + $0x3] ss:$8 sm:$0xf0] %vm290_vm0, %v1718_v9   ;;  %v1727_v13 = vpop.permute.xlu0 %1726 }
  0x9e   :  { %v1729_v14 = vunpack.i.h.bf16 %v1727_v13  ;;  %v1728_v15 = vunpack.i.l.bf16 %v1727_v13  ;;  %569 = vst.msk [vmem:[#allocation0 + $0xc3] ss:$8 sm:$0xf] %vm290_vm0, %v1724_v11   ;;  %571 = vst.msk [vmem:[#allocation0 + $0xc3] ss:$8 sm:$0xf0] %vm290_vm0, %v1724_v11  }
  0x9f   :  { %560 = vst.msk [vmem:[#allocation0 + $0x83] ss:$8 sm:$0xf] %vm290_vm0, %v1723_v12   ;;  %562 = vst.msk [vmem:[#allocation0 + $0x83] ss:$8 sm:$0xf0] %vm290_vm0, %v1723_v12   ;;  %v1732_v16 = vpop.permute.xlu1 %1731 }
  0xa0   :  { %587 = vst.msk [vmem:[#allocation0 + $0x143] ss:$8 sm:$0xf] %vm290_vm0, %v1729_v14   ;;  %589 = vst.msk [vmem:[#allocation0 + $0x143] ss:$8 sm:$0xf0] %vm290_vm0, %v1729_v14   ;;  %v1734_v17 = vunpack.i.h.bf16 %v1732_v16  ;;  %v1733_v18 = vunpack.i.l.bf16 %v1732_v16 }
  0xa1   :  { %578 = vst.msk [vmem:[#allocation0 + $0x103] ss:$8 sm:$0xf] %vm290_vm0, %v1728_v15   ;;  %580 = vst.msk [vmem:[#allocation0 + $0x103] ss:$8 sm:$0xf0] %vm290_vm0, %v1728_v15   ;;  %v611_v19 = vpop.permute.xlu0 %610  }
  0xa2   :  { %614 = vst.msk [vmem:[#allocation0 + $0x203] ss:$8 sm:$0xf] %vm290_vm0, %v611_v19   ;;  %616 = vst.msk [vmem:[#allocation0 + $0x203] ss:$8 sm:$0xf0] %vm290_vm0, %v611_v19  }
  0xa3   :  { %605 = vst.msk [vmem:[#allocation0 + $0x1c3] ss:$8 sm:$0xf] %vm290_vm0, %v1734_v17   ;;  %607 = vst.msk [vmem:[#allocation0 + $0x1c3] ss:$8 sm:$0xf0] %vm290_vm0, %v1734_v17   ;;  %v1737_v20 = vpop.permute.xlu1 %1736 }
  0xa4   :  { %596 = vst.msk [vmem:[#allocation0 + $0x183] ss:$8 sm:$0xf] %vm290_vm0, %v1733_v18   ;;  %598 = vst.msk [vmem:[#allocation0 + $0x183] ss:$8 sm:$0xf0] %vm290_vm0, %v1733_v18   ;;  %v1739_v21 = vunpack.i.h.bf16 %v1737_v20  ;;  %v1738_v22 = vunpack.i.l.bf16 %v1737_v20 }
  0xa5   :  { %v1742_v23 = vpop.permute.xlu0 %1741 }
  0xa6   :  { %v1744_v24 = vunpack.i.h.bf16 %v1742_v23  ;;  %v1743_v25 = vunpack.i.l.bf16 %v1742_v23  ;;  %631 = vst.msk [vmem:[#allocation0 + $0x44] ss:$8 sm:$0xf] %vm290_vm0, %v1739_v21   ;;  %633 = vst.msk [vmem:[#allocation0 + $0x44] ss:$8 sm:$0xf0] %vm290_vm0, %v1739_v21  }
  0xa7   :  { %622 = vst.msk [vmem:[#allocation0 + $0x4] ss:$8 sm:$0xf] %vm290_vm0, %v1738_v22   ;;  %624 = vst.msk [vmem:[#allocation0 + $0x4] ss:$8 sm:$0xf0] %vm290_vm0, %v1738_v22   ;;  %v1747_v26 = vpop.permute.xlu1 %1746 }
  0xa8   :  { %649 = vst.msk [vmem:[#allocation0 + $0xc4] ss:$8 sm:$0xf] %vm290_vm0, %v1744_v24   ;;  %651 = vst.msk [vmem:[#allocation0 + $0xc4] ss:$8 sm:$0xf0] %vm290_vm0, %v1744_v24   ;;  %v1749_v27 = vunpack.i.h.bf16 %v1747_v26  ;;  %v1748_v28 = vunpack.i.l.bf16 %v1747_v26 }
  0xa9   :  { %640 = vst.msk [vmem:[#allocation0 + $0x84] ss:$8 sm:$0xf] %vm290_vm0, %v1743_v25   ;;  %642 = vst.msk [vmem:[#allocation0 + $0x84] ss:$8 sm:$0xf0] %vm290_vm0, %v1743_v25   ;;  %v1752_v29 = vpop.permute.xlu0 %1751 }
  0xaa   :  { %v1754_v30 = vunpack.i.h.bf16 %v1752_v29  ;;  %v1753_v31 = vunpack.i.l.bf16 %v1752_v29  ;;  %667 = vst.msk [vmem:[#allocation0 + $0x144] ss:$8 sm:$0xf] %vm290_vm0, %v1749_v27   ;;  %669 = vst.msk [vmem:[#allocation0 + $0x144] ss:$8 sm:$0xf0] %vm290_vm0, %v1749_v27  }
  0xab   :  { %658 = vst.msk [vmem:[#allocation0 + $0x104] ss:$8 sm:$0xf] %vm290_vm0, %v1748_v28   ;;  %660 = vst.msk [vmem:[#allocation0 + $0x104] ss:$8 sm:$0xf0] %vm290_vm0, %v1748_v28   ;;  %v691_v32 = vpop.permute.xlu1 %690  }
  0xac   :  { %685 = vst.msk [vmem:[#allocation0 + $0x1c4] ss:$8 sm:$0xf] %vm290_vm0, %v1754_v30   ;;  %687 = vst.msk [vmem:[#allocation0 + $0x1c4] ss:$8 sm:$0xf0] %vm290_vm0, %v1754_v30  }
  0xad   :  { %676 = vst.msk [vmem:[#allocation0 + $0x184] ss:$8 sm:$0xf] %vm290_vm0, %v1753_v31   ;;  %678 = vst.msk [vmem:[#allocation0 + $0x184] ss:$8 sm:$0xf0] %vm290_vm0, %v1753_v31   ;;  %v1757_v33 = vpop.permute.xlu0 %1756 }
  0xae   :  { %694 = vst.msk [vmem:[#allocation0 + $0x204] ss:$8 sm:$0xf] %vm290_vm0, %v691_v32   ;;  %696 = vst.msk [vmem:[#allocation0 + $0x204] ss:$8 sm:$0xf0] %vm290_vm0, %v691_v32   ;;  %v1759_v34 = vunpack.i.h.bf16 %v1757_v33  ;;  %v1758_v35 = vunpack.i.l.bf16 %v1757_v33 }
  0xaf   :  { %v1762_v36 = vpop.permute.xlu1 %1761 }
  0xb0   :  { %711 = vst.msk [vmem:[#allocation0 + $0x45] ss:$8 sm:$0xf] %vm290_vm0, %v1759_v34   ;;  %713 = vst.msk [vmem:[#allocation0 + $0x45] ss:$8 sm:$0xf0] %vm290_vm0, %v1759_v34   ;;  %v1764_v37 = vunpack.i.h.bf16 %v1762_v36  ;;  %v1763_v38 = vunpack.i.l.bf16 %v1762_v36 }
  0xb1   :  { %702 = vst.msk [vmem:[#allocation0 + $0x5] ss:$8 sm:$0xf] %vm290_vm0, %v1758_v35   ;;  %704 = vst.msk [vmem:[#allocation0 + $0x5] ss:$8 sm:$0xf0] %vm290_vm0, %v1758_v35   ;;  %v1767_v39 = vpop.permute.xlu0 %1766 }
  0xb2   :  { %v1769_v40 = vunpack.i.h.bf16 %v1767_v39  ;;  %v1768_v41 = vunpack.i.l.bf16 %v1767_v39  ;;  %729 = vst.msk [vmem:[#allocation0 + $0xc5] ss:$8 sm:$0xf] %vm290_vm0, %v1764_v37   ;;  %731 = vst.msk [vmem:[#allocation0 + $0xc5] ss:$8 sm:$0xf0] %vm290_vm0, %v1764_v37  }
  0xb3   :  { %720 = vst.msk [vmem:[#allocation0 + $0x85] ss:$8 sm:$0xf] %vm290_vm0, %v1763_v38   ;;  %722 = vst.msk [vmem:[#allocation0 + $0x85] ss:$8 sm:$0xf0] %vm290_vm0, %v1763_v38   ;;  %v1772_v42 = vpop.permute.xlu1 %1771 }
  0xb4   :  { %747 = vst.msk [vmem:[#allocation0 + $0x145] ss:$8 sm:$0xf] %vm290_vm0, %v1769_v40   ;;  %749 = vst.msk [vmem:[#allocation0 + $0x145] ss:$8 sm:$0xf0] %vm290_vm0, %v1769_v40   ;;  %v1774_v43 = vunpack.i.h.bf16 %v1772_v42  ;;  %v1773_v44 = vunpack.i.l.bf16 %v1772_v42 }
  0xb5   :  { %738 = vst.msk [vmem:[#allocation0 + $0x105] ss:$8 sm:$0xf] %vm290_vm0, %v1768_v41   ;;  %740 = vst.msk [vmem:[#allocation0 + $0x105] ss:$8 sm:$0xf0] %vm290_vm0, %v1768_v41   ;;  %v771_v45 = vpop.permute.xlu0 %770  }
  0xb6   :  { %774 = vst.msk [vmem:[#allocation0 + $0x205] ss:$8 sm:$0xf] %vm290_vm0, %v771_v45   ;;  %776 = vst.msk [vmem:[#allocation0 + $0x205] ss:$8 sm:$0xf0] %vm290_vm0, %v771_v45  }
  0xb7   :  { %765 = vst.msk [vmem:[#allocation0 + $0x1c5] ss:$8 sm:$0xf] %vm290_vm0, %v1774_v43   ;;  %767 = vst.msk [vmem:[#allocation0 + $0x1c5] ss:$8 sm:$0xf0] %vm290_vm0, %v1774_v43  }
  0xb8   :  { %v781_v46 = vld [vmem:[#allocation0] sm:$0xff]  ;;  %v786_v47 = vld [vmem:[#allocation0 + $0x8] sm:$0xff]  ;;  %v792_v48 = vld [vmem:[#allocation0 + $0x10] sm:$0xff]  ;;  %756 = vst.msk [vmem:[#allocation0 + $0x185] ss:$8 sm:$0xf] %vm290_vm0, %v1773_v44  }
  0xb9   :  { %758 = vst.msk [vmem:[#allocation0 + $0x185] ss:$8 sm:$0xf0] %vm290_vm0, %v1773_v44   ;;  %v799_v49 = vld [vmem:[#allocation0 + $0x18] sm:$0xff]  ;;  %v806_v50 = vld [vmem:[#allocation0 + $0x20] sm:$0xff]  ;;  %v813_v51 = vld [vmem:[#allocation0 + $0x28] sm:$0xff]  ;;  %v1458_v52 = vpack.c.bf16 %v786_v47, %v781_v46 }
  0xba   :  { %v820_v53 = vld [vmem:[#allocation0 + $0x30] sm:$0xff]  ;;  %v827_v54 = vld [vmem:[#allocation0 + $0x38] sm:$0xff]  ;;  %v1463_v55 = vpack.c.bf16 %v799_v49, %v792_v48  ;;  %v1468_v56 = vpack.c.bf16 %v813_v51, %v806_v50  ;;  %v946_v57 = vld [vmem:[#allocation0 + $0xc0] sm:$0xff] }
  0xbb   :  { %v953_v58 = vld [vmem:[#allocation0 + $0xc8] sm:$0xff]  ;;  %v960_v59 = vld [vmem:[#allocation0 + $0xd0] sm:$0xff]  ;;  %v1473_v60 = vpack.c.bf16 %v827_v54, %v820_v53  ;;  %1459 = vst [vmem:[%s2022_s1] sm:$0xff] %v1458_v52   ;;  %v967_v62 = vld [vmem:[#allocation0 + $0xd8] sm:$0xff] }
  0xbc   :  { %v1518_v61 = vpack.c.bf16 %v953_v58, %v946_v57  ;;  %v974_v63 = vld [vmem:[#allocation0 + $0xe0] sm:$0xff]  ;;  %v981_v0 = vld [vmem:[#allocation0 + $0xe8] sm:$0xff]  ;;  %1635 = vst [vmem:[%s2022_s1 + $0x8] sm:$0xff] %v1463_v55   ;;  %1636 = vst [vmem:[%s2022_s1 + $0x10] sm:$0xff] %v1468_v56   ;;  %v1523_v2 = vpack.c.bf16 %v967_v62, %v960_v59 }
  0xbd   :  { %v834_v1 = vld [vmem:[#allocation0 + $0x40] sm:$0xff]  ;;  %v1528_v3 = vpack.c.bf16 %v981_v0, %v974_v63  ;;  %v988_v4 = vld [vmem:[#allocation0 + $0xf0] sm:$0xff]  ;;  %v995_v5 = vld [vmem:[#allocation0 + $0xf8] sm:$0xff]  ;;  %1637 = vst [vmem:[%s2022_s1 + $0x18] sm:$0xff] %v1473_v60  }
  0xbe   :  { %v890_v6 = vld [vmem:[#allocation0 + $0x80] sm:$0xff]  ;;  %1646 = vst [vmem:[%s2022_s1 + $0x60] sm:$0xff] %v1518_v61   ;;  %v1533_v7 = vpack.c.bf16 %v995_v5, %v988_v4  ;;  %v897_v8 = vld [vmem:[#allocation0 + $0x88] sm:$0xff]  ;;  %v904_v9 = vld [vmem:[#allocation0 + $0x90] sm:$0xff] }
  0xbf   :  { %v911_v10 = vld [vmem:[#allocation0 + $0x98] sm:$0xff]  ;;  %1647 = vst [vmem:[%s2022_s1 + $0x68] sm:$0xff] %v1523_v2   ;;  %1648 = vst [vmem:[%s2022_s1 + $0x70] sm:$0xff] %v1528_v3   ;;  %v918_v11 = vld [vmem:[#allocation0 + $0xa0] sm:$0xff]  ;;  %v1498_v14 = vpack.c.bf16 %v897_v8, %v890_v6 }
  0xc0   :  { %v925_v12 = vld [vmem:[#allocation0 + $0xa8] sm:$0xff]  ;;  %v932_v13 = vld [vmem:[#allocation0 + $0xb0] sm:$0xff]  ;;  %v1503_v15 = vpack.c.bf16 %v911_v10, %v904_v9  ;;  %1649 = vst [vmem:[%s2022_s1 + $0x78] sm:$0xff] %v1533_v7   ;;  %v939_v16 = vld [vmem:[#allocation0 + $0xb8] sm:$0xff] }
  0xc1   :  { %v841_v17 = vld [vmem:[#allocation0 + $0x48] sm:$0xff]  ;;  %v848_v18 = vld [vmem:[#allocation0 + $0x50] sm:$0xff]  ;;  %v1508_v19 = vpack.c.bf16 %v925_v12, %v918_v11  ;;  %v855_v20 = vld [vmem:[#allocation0 + $0x58] sm:$0xff]  ;;  %v1513_v23 = vpack.c.bf16 %v939_v16, %v932_v13  ;;  %1642 = vst [vmem:[%s2022_s1 + $0x40] sm:$0xff] %v1498_v14  }
  0xc2   :  { %v862_v21 = vld [vmem:[#allocation0 + $0x60] sm:$0xff]  ;;  %v869_v22 = vld [vmem:[#allocation0 + $0x68] sm:$0xff]  ;;  %v1478_v24 = vpack.c.bf16 %v841_v17, %v834_v1  ;;  %1643 = vst [vmem:[%s2022_s1 + $0x48] sm:$0xff] %v1503_v15   ;;  %v876_v25 = vld [vmem:[#allocation0 + $0x70] sm:$0xff]  ;;  %v1483_v28 = vpack.c.bf16 %v855_v20, %v848_v18 }
  0xc3   :  { %v883_v26 = vld [vmem:[#allocation0 + $0x78] sm:$0xff]  ;;  %v1114_v27 = vld [vmem:[#allocation0 + $0x180] sm:$0xff]  ;;  %v1488_v29 = vpack.c.bf16 %v869_v22, %v862_v21  ;;  %1644 = vst [vmem:[%s2022_s1 + $0x50] sm:$0xff] %v1508_v19   ;;  %v1121_v30 = vld [vmem:[#allocation0 + $0x188] sm:$0xff] }
  0xc4   :  { %v1128_v31 = vld [vmem:[#allocation0 + $0x190] sm:$0xff]  ;;  %v1135_v32 = vld [vmem:[#allocation0 + $0x198] sm:$0xff]  ;;  %v1493_v33 = vpack.c.bf16 %v883_v26, %v876_v25  ;;  %1645 = vst [vmem:[%s2022_s1 + $0x58] sm:$0xff] %v1513_v23   ;;  %1638 = vst [vmem:[%s2022_s1 + $0x20] sm:$0xff] %v1478_v24   ;;  %v1578_v34 = vpack.c.bf16 %v1121_v30, %v1114_v27 }
  0xc5   :  { %v1583_v35 = vpack.c.bf16 %v1135_v32, %v1128_v31  ;;  %v1142_v36 = vld [vmem:[#allocation0 + $0x1a0] sm:$0xff]  ;;  %v1149_v37 = vld [vmem:[#allocation0 + $0x1a8] sm:$0xff]  ;;  %v1156_v38 = vld [vmem:[#allocation0 + $0x1b0] sm:$0xff]  ;;  %1639 = vst [vmem:[%s2022_s1 + $0x28] sm:$0xff] %v1483_v28  }
  0xc6   :  { %1640 = vst [vmem:[%s2022_s1 + $0x30] sm:$0xff] %v1488_v29   ;;  %v1588_v39 = vpack.c.bf16 %v1149_v37, %v1142_v36  ;;  %v1163_v40 = vld [vmem:[#allocation0 + $0x1b8] sm:$0xff]  ;;  %v1170_v41 = vld [vmem:[#allocation0 + $0x1c0] sm:$0xff]  ;;  %v1177_v42 = vld [vmem:[#allocation0 + $0x1c8] sm:$0xff] }
  0xc7   :  { %1641 = vst [vmem:[%s2022_s1 + $0x38] sm:$0xff] %v1493_v33   ;;  %1658 = vst [vmem:[%s2022_s1 + $0xc0] sm:$0xff] %v1578_v34   ;;  %v1593_v43 = vpack.c.bf16 %v1163_v40, %v1156_v38  ;;  %v1598_v44 = vpack.c.bf16 %v1177_v42, %v1170_v41  ;;  %v1184_v45 = vld [vmem:[#allocation0 + $0x1d0] sm:$0xff]  ;;  %v1191_v46 = vld [vmem:[#allocation0 + $0x1d8] sm:$0xff] }
  0xc8   :  { %1659 = vst [vmem:[%s2022_s1 + $0xc8] sm:$0xff] %v1583_v35   ;;  %v1198_v47 = vld [vmem:[#allocation0 + $0x1e0] sm:$0xff]  ;;  %1660 = vst [vmem:[%s2022_s1 + $0xd0] sm:$0xff] %v1588_v39   ;;  %v1603_v48 = vpack.c.bf16 %v1191_v46, %v1184_v45  ;;  %v1205_v49 = vld [vmem:[#allocation0 + $0x1e8] sm:$0xff] }
  0xc9   :  { %v1212_v50 = vld [vmem:[#allocation0 + $0x1f0] sm:$0xff]  ;;  %v1219_v51 = vld [vmem:[#allocation0 + $0x1f8] sm:$0xff]  ;;  %1661 = vst [vmem:[%s2022_s1 + $0xd8] sm:$0xff] %v1593_v43   ;;  %1662 = vst [vmem:[%s2022_s1 + $0xe0] sm:$0xff] %v1598_v44   ;;  %v1608_v52 = vpack.c.bf16 %v1205_v49, %v1198_v47 }
  0xca   :  { %v1613_v53 = vpack.c.bf16 %v1219_v51, %v1212_v50  ;;  %v1002_v54 = vld [vmem:[#allocation0 + $0x100] sm:$0xff]  ;;  %v1009_v55 = vld [vmem:[#allocation0 + $0x108] sm:$0xff]  ;;  %v1016_v56 = vld [vmem:[#allocation0 + $0x110] sm:$0xff]  ;;  %1663 = vst [vmem:[%s2022_s1 + $0xe8] sm:$0xff] %v1603_v48  }
  0xcb   :  { %v1538_v57 = vpack.c.bf16 %v1009_v55, %v1002_v54  ;;  %v1023_v58 = vld [vmem:[#allocation0 + $0x118] sm:$0xff]  ;;  %v1030_v59 = vld [vmem:[#allocation0 + $0x120] sm:$0xff]  ;;  %v1037_v60 = vld [vmem:[#allocation0 + $0x128] sm:$0xff]  ;;  %1664 = vst [vmem:[%s2022_s1 + $0xf0] sm:$0xff] %v1608_v52  }
  0xcc   :  { %1665 = vst [vmem:[%s2022_s1 + $0xf8] sm:$0xff] %v1613_v53   ;;  %v1543_v61 = vpack.c.bf16 %v1023_v58, %v1016_v56  ;;  %v1044_v62 = vld [vmem:[#allocation0 + $0x130] sm:$0xff]  ;;  %v1051_v63 = vld [vmem:[#allocation0 + $0x138] sm:$0xff]  ;;  %v1058_v0 = vld [vmem:[#allocation0 + $0x140] sm:$0xff]  ;;  %v1548_v1 = vpack.c.bf16 %v1037_v60, %v1030_v59 }
  0xcd   :  { %1650 = vst [vmem:[%s2022_s1 + $0x80] sm:$0xff] %v1538_v57   ;;  %v1065_v2 = vld [vmem:[#allocation0 + $0x148] sm:$0xff]  ;;  %v1072_v3 = vld [vmem:[#allocation0 + $0x150] sm:$0xff]  ;;  %v1079_v4 = vld [vmem:[#allocation0 + $0x158] sm:$0xff]  ;;  %v1553_v5 = vpack.c.bf16 %v1051_v63, %v1044_v62 }
  0xce   :  { %1651 = vst [vmem:[%s2022_s1 + $0x88] sm:$0xff] %v1543_v61   ;;  %v1086_v6 = vld [vmem:[#allocation0 + $0x160] sm:$0xff]  ;;  %v1093_v7 = vld [vmem:[#allocation0 + $0x168] sm:$0xff]  ;;  %v1100_v8 = vld [vmem:[#allocation0 + $0x170] sm:$0xff]  ;;  %v1558_v9 = vpack.c.bf16 %v1065_v2, %v1058_v0  ;;  %v1563_v10 = vpack.c.bf16 %v1079_v4, %v1072_v3 }
  0xcf   :  { %1652 = vst [vmem:[%s2022_s1 + $0x90] sm:$0xff] %v1548_v1   ;;  %v1107_v11 = vld [vmem:[#allocation0 + $0x178] sm:$0xff]  ;;  %v1226_v12 = vld [vmem:[#allocation0 + $0x200] sm:$0xff]  ;;  %v1233_v13 = vld [vmem:[#allocation0 + $0x208] sm:$0xff]  ;;  %v1568_v14 = vpack.c.bf16 %v1093_v7, %v1086_v6 }
  0xd0   :  { %1653 = vst [vmem:[%s2022_s1 + $0x98] sm:$0xff] %v1553_v5   ;;  %v1618_v15 = vpack.c.bf16 %v1233_v13, %v1226_v12  ;;  %v1240_v16 = vld [vmem:[#allocation0 + $0x210] sm:$0xff]  ;;  %v1247_v17 = vld [vmem:[#allocation0 + $0x218] sm:$0xff]  ;;  %v1254_v18 = vld [vmem:[#allocation0 + $0x220] sm:$0xff]  ;;  %v1573_v19 = vpack.c.bf16 %v1107_v11, %v1100_v8 }
  0xd1   :  { %1654 = vst [vmem:[%s2022_s1 + $0xa0] sm:$0xff] %v1558_v9   ;;  %1655 = vst [vmem:[%s2022_s1 + $0xa8] sm:$0xff] %v1563_v10   ;;  %v1623_v20 = vpack.c.bf16 %v1247_v17, %v1240_v16  ;;  %v1261_v21 = vld [vmem:[#allocation0 + $0x228] sm:$0xff]  ;;  %v1268_v22 = vld [vmem:[#allocation0 + $0x230] sm:$0xff] }
  0xd2   :  { %v1275_v23 = vld [vmem:[#allocation0 + $0x238] sm:$0xff]  ;;  %1656 = vst [vmem:[%s2022_s1 + $0xb0] sm:$0xff] %v1568_v14   ;;  %1666 = vst [vmem:[%s2022_s1 + $0x100] sm:$0xff] %v1618_v15   ;;  %v1628_v24 = vpack.c.bf16 %v1261_v21, %v1254_v18 }
  0xd3   :  { %v1633_v25 = vpack.c.bf16 %v1275_v23, %v1268_v22  ;;  %1657 = vst [vmem:[%s2022_s1 + $0xb8] sm:$0xff] %v1573_v19   ;;  %1667 = vst [vmem:[%s2022_s1 + $0x108] sm:$0xff] %v1623_v20  }
  0xd4   :  { %1668 = vst [vmem:[%s2022_s1 + $0x110] sm:$0xff] %v1628_v24  }
  0xd5   :  { %1669 = vst [vmem:[%s2022_s1 + $0x118] sm:$0xff] %v1633_v25  }

// kernel: conv3d_bn_relu.1
= control target key start
LH: loop header
LB: loop body
LE: loop exit
PB: predicated region body
PF: predicated region fallthrough
CT: control target
= control target key end

     0   :  { %s868_s12 = smov 0   ;;  %s870_s13 = smov 0   ;;  %s976_s0 = inlined_call_operand.vmem [shape: bf16[80,18], index: 0, kind: input, shape index: {}]   ;;  %s977_s1 = inlined_call_operand.vmem [shape: bf16[18,128], index: 1, kind: input, shape index: {}]   ;;  %s978_s2 = inlined_call_operand.vmem [shape: f32[1,128], index: 2, kind: input, shape index: {}]   ;;  %s979_s3 = inlined_call_operand.vmem [shape: bf16[80,128], index: 3, kind: output, shape index: {}]  }
   0x1   :  { %s872_s14 = smov 0  }
   0x2 LB: > { %s881_s15 = sadd.s32 4294967295, %s812_s14   ;;  %s883_s16 = sadd.s32 1, %s812_s14   ;;  %s812_s14 = sphi %s872_s14, %s986_s14   ;;  %s808_s13 = sphi %s870_s13, %s985_s13   ;;  %s804_s12 = sphi %s868_s12, %s984_s12  }
   0x3   : > { %s85_s17 = ssub.s32 %s812_s14, %s883_s16  ;;  %s88_s18 = sadd.s32 1, %s808_s13 }
   0x4   : > { %p86_p0 = scmp.eq.s32.totalorder %s85_s17, 0  ;;  %p98_p1 = scmp.ne.s32.totalorder %s808_s13, %s804_s12 }
   0x5   : > { %p99_p2 = scmp.eq.s32.totalorder %s881_s15, 1  ;;  %p579_p3 = scmp.ge.s32.totalorder %s812_s14, 1 }
   0x6   : > { %s891_s19 = scalar_select %p86_p0, %s808_s13, %s88_s18  }
   0x7   : > { %p893_p4 = por %p99_p2, %p98_p1  ;;  %p146_p5 = scmp.lt.s32.totalorder %s812_s14, 3 }
   0x9   : > { %p147_p6 = pnand %p579_p3, %p146_p5 }
   0xa   : > { %v749_v0 = vld [vmem:[%s977_s1] sm:$0xff] (!%p147_p6)   ;;  %v846_v1 = vmov (!%p147_p6), 0.0   ;;  %v750_v2 = vld [vmem:[%s977_s1 + $0x8] ss:$0 sps:$4 sm:$0x11] (!%p147_p6)   ;;  %vm243_vm0 = vcmask (!%p147_p6), 1040384  }
   0xb   : > { %150 = sbr.rel (%p147_p6) target bundleno = 316 (0x13c), region = 32  ;;  %653 = vmatprep.subr.bf16.mxu1 (!%p147_p6), %v846_v1  ;;  %637 = vmatprep.subr.bf16.mxu0 (!%p147_p6), %v846_v1  ;;  %v245_v3 = vsel (!%p147_p6), %vm243_vm0, %v750_v2, 0  ;;  %vm847_vm1 = vmmov (!%p147_p6), 0   ;;  %vm233_vm2 = vcmask (!%p147_p6), 146432   ;;  %v581_v7 = vld [vmem:[%s978_s2] ss:$0 sm:$0xff] (!%p147_p6) }
   0xc   : > { %655 = vmatpush3.bf16.msra.mxu1 (!%p147_p6), %v749_v0  ;;  %638 = vmatpush3.bf16.msra.mxu0 (!%p147_p6), %v749_v0  ;;  %s904_s25 = smul.u32 (!%p147_p6), 6, %s881_s15  ;;  %s170_s6 = sand.u32 (!%p147_p6), 1, %s804_s12  }
   0xd   : > { %654 = vmatprep.subr.bf16.mxu1 (!%p147_p6), %v846_v1  ;;  %645 = vmatprep.mubr.msk.bf16.mxu1 (!%p147_p6), %vm847_vm1, %v846_v1  ;;  %s657_s7 = smul.u32 (!%p147_p6), 24, %s170_s6 }
   0xe   : > { %p178_p7 = scmp.lt.s32.totalorder (!%p147_p6), %s904_s25, 9  ;;  %639 = vmatprep.subr.bf16.mxu0 (!%p147_p6), %v846_v1  ;;  %641 = vmatprep.mubr.msk.bf16.mxu0 (!%p147_p6), %vm847_vm1, %v846_v1 }
   0xf   : > { %s915_s8 = scalar_lea.vmem (!%p147_p6), [#allocation2], %s657_s7  }
  0x10   : > { %656 = vmatpush3.bf16.msra.mxu1 (!%p147_p6), %v245_v3  ;;  %640 = vmatpush3.bf16.msra.mxu0 (!%p147_p6), %v245_v3 }
  0x12   : > { %s179_s26 = scalar_select %p178_p7, %s904_s25, 9 }
  0x13   : > { %s348_s9 = ssub.s32 (%p893_p4), 10, %s904_s25  ;;  %s614_s10 = smul.u32 (%p893_p4), 24, %s881_s15 }
  0x14   : > { %s580_s27 = sshll.u32 %s179_s26, 2  ;;  %p349_p8 = scmp.lt.s32.totalorder (%p893_p4), %s348_s9, 6 }
  0x15   : > { %s181_s30 = scalar_lea.vmem %s976_s0, %s580_s27  ;;  %s927_s14 = scalar_lea.vmem (%p893_p4), %s979_s3, %s614_s10  }
  0x16   : > { %v751_v4 = vld [vmem:[%s181_s30 + $0x8] sm:$0xff]   ;;  %v752_v5 = vld [vmem:[%s181_s30] sm:$0xff]   ;;  %v753_v6 = vld [vmem:[%s181_s30 + $0x10] sm:$0xff]  }
  0x17   : > { %646 = vmatmul.mubr.msk.bf16.vlgmr.msra.gmra.mrb[0].mxu1 %vm233_vm2, %v751_v4  ;;  %642 = vmatmul.mubr.msk.bf16.vlgmr.msra.gmra.mrb[0].mxu0 %vm233_vm2, %v752_v5 }
  0x18   : > { %649 = vmatprep.mubr.msk.bf16.mxu1 %vm847_vm1, %v846_v1 }
  0x1f   : > { %650 = vmatmul.mubr.msk.bf16.gmra.mrb[4].mxu1 %vm233_vm2, %v753_v6 }
  0xea   : > { %v289_v8 = vpop.f32.mrb[0].mxu1  ;;  %v281_v11 = vpop.f32.mrb[0].mxu0 }
  0xeb   : > { %v290_v9 = vadd.f32 %v581_v7, %v289_v8  ;;  %v647_v10 = vpop.f32.mrb[1].mxu1  ;;  %v282_v13 = vadd.f32 %v581_v7, %v281_v11  ;;  %v643_v14 = vpop.f32.mrb[1].mxu0 }
  0xec   : > { %v292_v12 = vpop.f32.mrb[2].mxu1  ;;  %v284_v17 = vpop.f32.mrb[2].mxu0 }
  0xed   : > { %v293_v15 = vadd.f32 %v581_v7, %v292_v12  ;;  %v648_v16 = vpop.f32.mrb[3].mxu1  ;;  %v304_v18 = vmax.f32 %v282_v13, 0.0  ;;  %v285_v19 = vadd.f32 %v581_v7, %v284_v17  ;;  %v644_v20 = vpop.f32.mrb[3].mxu0  ;;  %v306_v21 = vmax.f32 %v290_v9, 0.0 }
  0xef   : > { %v307_v22 = vmax.f32 %v293_v15, 0.0  ;;  %v305_v23 = vmax.f32 %v285_v19, 0.0 }
  0xf1   : > { %v623_v24 = vpack.c.bf16 %v307_v22, %v306_v21  ;;  %v618_v25 = vpack.c.bf16 %v305_v23, %v304_v18 }
  0xf2   : > { %v297_v26 = vpop.f32.mrb[4].mxu1 }
  0xf3   : > { %630 = vst [vmem:[%s915_s8 + $0x8] sm:$0xff] %v623_v24   ;;  %v298_v27 = vadd.f32 %v581_v7, %v297_v26  ;;  %v651_v28 = vpop.f32.mrb[5].mxu1  ;;  %619 = vst [vmem:[%s915_s8] sm:$0xff] %v618_v25  }
  0xf4   : > { %v300_v29 = vpop.f32.mrb[6].mxu1 }
  0xf5   : > { %v301_v30 = vadd.f32 %v581_v7, %v300_v29  ;;  %v652_v31 = vpop.f32.mrb[7].mxu1  ;;  %v308_v32 = vmax.f32 %v298_v27, 0.0  ;;  %346 = sbr.rel (!%p893_p4) target bundleno = 316 (0x13c), region = 36 }
  0xf7   : > { %v309_v33 = vmax.f32 %v301_v30, 0.0 }
  0xf9   : > { %v628_v34 = vpack.c.bf16 %v309_v33, %v308_v32 }
  0xfb   : > { %631 = vst [vmem:[%s915_s8 + $0x10] sm:$0xff] %v628_v34  }
  0xfc   : > { %s988_s9 = smov (!%p349_p8, %s348_s9), 6 }
  0xfd   : > { %s596_s17 = sshll.u32 %s988_s9, 6 }
  0xfe   : > { %p599_p9 = scmp.eq.s32.totalorder %s596_s17, 0 }
  0xff   : > { %754 = sdivrem.u32 (!%p599_p9), %s988_s9, 6 }
 0x100   : > { %357 = sbr.rel (%p599_p9) target bundleno = 316 (0x13c), region = 40 }
 0x108   : > { %s933_s18 = spop.drf %754 }
 0x109   : > { %p600_p10 = scmp.le.s32.totalorder %s933_s18, 0 }
 0x10a   : > { %s981_s15 = smov (!%p600_p10), %s927_s14  ;;  %s982_s20 = smov (!%p600_p10), %s915_s8 }
 0x10b   : > { %532 = sbr.rel (%p600_p10) target bundleno = 287 (0x11f), region = 112  ;;  %s942_s21 = smov (!%p600_p10), 0  }
 0x10c   : > { %s944_s22 = smov (!%p600_p10), 0  }
 0x112 LB: >> { %v374_v35 = vld [vmem:[%s820_s20] sm:$0xf]  ;;  %v376_v36 = vld [vmem:[%s820_s20 + $0x4] sm:$0xf]  ;;  %v378_v37 = vld [vmem:[%s820_s20 + $0x8] sm:$0xf]  ;;  %s828_s22 = sphi %s944_s22, %s368_s22   ;;  %s824_s21 = sphi %s942_s21, %s983_s21   ;;  %s820_s20 = sphi %s982_s20, %s391_s20   ;;  %s816_s15 = sphi %s981_s15, %s392_s15  }
 0x113   : >> { %375 = vst [vmem:[%s816_s15] sm:$0xf] %v374_v35  ;;  %377 = vst [vmem:[%s816_s15 + $0x4] sm:$0xf] %v376_v36  ;;  %v380_v38 = vld [vmem:[%s820_s20 + $0xc] sm:$0xf]  ;;  %s386_s23 = sadd.s32 1, %s824_s21 }
 0x114   : >> { %379 = vst [vmem:[%s816_s15 + $0x8] sm:$0xf] %v378_v37  ;;  %v382_v39 = vld [vmem:[%s820_s20 + $0x10] sm:$0xf]  ;;  %v384_v40 = vld [vmem:[%s820_s20 + $0x14] sm:$0xf]  ;;  %p387_p11 = scmp.ge.s32.totalorder %s386_s23, %s933_s18 }
 0x115   : >> { %381 = vst [vmem:[%s816_s15 + $0xc] sm:$0xf] %v380_v38  ;;  %383 = vst [vmem:[%s816_s15 + $0x10] sm:$0xf] %v382_v39  ;;  %s368_s22 = sadd.s32 1, %s828_s22  }
 0x116   : >> { %385 = vst [vmem:[%s816_s15 + $0x14] sm:$0xf] %v384_v40  ;;  %s990_s23 = smov (%p387_p11, %s386_s23), 0  ;;  %p367_p12 = scmp.ge.s32.totalorder %s368_s22, %s933_s18 }
 0x117   : >> { %s389_s24 = smul.u32 24, %s990_s23  ;;  %s983_s21 = smov %s990_s23 }
 0x118   : > { %370 = sbr.rel (!%p367_p12) target bundleno = 274 (0x112), region = 118 }
 0x119   : >> { %s391_s20 = scalar_lea.vmem %s915_s8, %s389_s24 [#allocation2]   ;;  %s392_s15 = scalar_lea.vmem %s927_s14, %s389_s24  }
 0x11f PF: > { %756 = sdivrem.u32 %s988_s9, 6 }
 0x120   : > { %s601_s25 = smul.u32 24, %s933_s18 }
 0x122   : > { %s397_s26 = scalar_lea.vmem %s915_s8, %s601_s25 [#allocation2]   ;;  %s399_s27 = scalar_lea.vmem %s927_s14, %s601_s25  }
 0x128   : > { %s757_s28 = spop.drf %756 }
 0x129   : > { %p603_p13 = scmp.le.s32.totalorder %s757_s28, 0 }
 0x12a   : > { %s830_s29 = smov (!%p603_p13), %s399_s27   ;;  %s834_s30 = smov (!%p603_p13), %s397_s26  }
 0x12b   : > { %546 = sbr.rel (%p603_p13) target bundleno = 316 (0x13c), region = 123  ;;  %s838_s4 = smov (!%p603_p13), 0  }
 0x12c   : > { %s842_s5 = smov (!%p603_p13), 0  }
 0x132 LB: >> { %v409_v41 = vld [vmem:[%s836_s30] sm:$0xf]  ;;  %s411_s6 = sadd.s32 1, %s840_s4  ;;  %s403_s5 = sadd.s32 1, %s844_s5   ;;  %s844_s5 = sphi %s842_s5, %s403_s5   ;;  %s840_s4 = sphi %s838_s4, %s839_s4   ;;  %s836_s30 = sphi %s834_s30, %s416_s30   ;;  %s832_s29 = sphi %s830_s29, %s417_s29  }
 0x133   : >> { %410 = vst [vmem:[%s832_s29] sm:$0xf] %v409_v41  ;;  %p412_p0 = scmp.ge.s32.totalorder %s411_s6, %s757_s28  ;;  %p402_p1 = scmp.ge.s32.totalorder %s403_s5, %s757_s28 }
 0x135   : >> { %s992_s6 = smov (%p412_p0, %s411_s6), 0  ;;  %405 = sbr.rel (!%p402_p1) target bundleno = 306 (0x132), region = 129 }
 0x136   : >> { %s604_s7 = sshll.u32 %s992_s6, 2  ;;  %s839_s4 = smov %s992_s6  }
 0x137   : >> { %s416_s30 = scalar_lea.vmem %s397_s26, %s604_s7 [#allocation2]   ;;  %s417_s29 = scalar_lea.vmem %s399_s27, %s604_s7  }
 0x13c PF: > { %p10_p2 = scmp.ge.s32.totalorder %s883_s16, 4   ;;  %s984_s12 = smov %s808_s13 }
 0x13d   : > { %s985_s13 = smov %s891_s19  ;;  %s986_s14 = smov %s883_s16 }
 0x13e   :  { %12 = sbr.rel (!%p10_p2) target bundleno = 2 (0x2), region = 140 }

</bundles_post_ra>
